<compile_context>
chip_gen: v6e
topology: v6e:2x2x1
jax: 0.10.0
libtpu: 0.0.40
codegen_flags: <defaults>
</compile_context>

<pallas_src>
import math

import jax
import jax.numpy as jnp
from jax.experimental import pallas as pl
from jax.experimental.pallas import tpu as pltpu


def _round_up(n, m):
    return ((n + m - 1) // m) * m


# --------------------------------------------------------------------------
# Hardware detection + tile selection
# --------------------------------------------------------------------------

def _tpu_generation_and_vmem():
    """Best-effort TPU generation (5/6/7/...) and physical VMEM bytes."""
    gen = 0
    try:
        kind = jax.devices()[0].device_kind.lower()
        for g in (7, 6, 5, 4):
            if str(g) in kind:
                gen = g
                break
    except Exception:
        pass
    vmem = None
    try:
        info = pltpu.get_tpu_info()
        vmem = int(getattr(info, "vmem_capacity_bytes"))
    except Exception:
        vmem = None
    if vmem is None or vmem <= 0:
        if gen >= 7:
            vmem = 64 << 20          # v7x: 64 MiB per TensorCore
        elif gen in (5, 6):
            vmem = 128 << 20         # v5e / v6e: 128 MiB
        else:
            vmem = 64 << 20          # conservative default
    return gen, vmem


def _roofline_tb(gen):
    """Batch-tile target so the weight-restream schedule is ~MXU-bound."""
    if gen >= 7:
        return 384                   # ~310 flops/byte per-TC on v7x
    if gen == 6:
        return 768                   # ~700-750 flops/byte on v6e
    return 256                       # v5e ~240 flops/byte (near balance)


def _select_hidden_tile(S, H):
    """Hidden-dim tile th (lane-aligned) chosen once, independent of batch."""
    gen, vmem_phys = _tpu_generation_and_vmem()
    Sp = _round_up(S, 128)
    Hp128 = _round_up(H, 128)
    th_target = 1024 if gen == 6 else 512
    th = min(th_target, Hp128)
    th = max(128, _round_up(th, 128))
    # Both weight slabs, double-buffered (8 * Sp * th bytes total in bf16),
    # must not eat more than ~40% of physical VMEM.
    while th > 128 and 8 * Sp * th > int(0.4 * vmem_phys):
        th = max(128, _round_up(th // 2, 128))
    return th, Sp


def _select_batch_tile(B, Sp, th, x_itemsize, out_itemsize, needs_acc):
    gen, vmem_phys = _tpu_generation_and_vmem()
    vmem_budget = int(0.85 * vmem_phys)

    tb = _roofline_tb(gen)
    tb = min(tb, _round_up(B, 8))
    tb = max(8, _round_up(tb, 8))

    def vmem_need(tb_):
        n = (2 * tb_ * Sp * x_itemsize        # x tile, double-buffered
             + 8 * Sp * th                    # two bf16 weight slabs, double-buffered
             + 2 * th * 4 + 2 * Sp * 4        # bias slabs
             + 2 * tb_ * Sp * out_itemsize    # output tile
             + tb_ * th * 4)                  # h intermediate
        if needs_acc:
            n += tb_ * Sp * 4                 # f32 accumulator scratch
        return n

    while vmem_need(tb) > vmem_budget and tb > 8:
        tb = max(8, _round_up(tb // 2, 8))

    # v7x megacore: the "parallel" batch axis needs >= 2 steps to use both TCs.
    if gen >= 7:
        while _round_up(B, tb) // tb < 2 and tb > 8:
            tb = max(8, _round_up(tb // 2, 8))

    vmem_limit = max(int(vmem_need(tb) * 1.25) + (4 << 20), 16 << 20)
    vmem_limit = min(vmem_limit, vmem_budget)
    return tb, vmem_limit


# --------------------------------------------------------------------------
# Kernels
# --------------------------------------------------------------------------

def _sae_kernel_f32out(x_ref, we_ref, be_ref, wd_ref, bd_ref, o_ref):
    """f32 output: accumulate directly into the resident output block.

    x_ref : (tb, Sp)   input tile (native dtype, cast to bf16 for the MXU)
    we_ref: (Sp, th)   encoder weight slab (contiguous pre-tiled, bf16)
    be_ref: (1, th)    encoder bias slab (f32)
    wd_ref: (th, Sp)   decoder weight slab (bf16)
    bd_ref: (1, Sp)    decoder bias (f32, grid-invariant)
    o_ref : (tb, Sp)   f32 output, resident across k
    """
    k = pl.program_id(1)

    @pl.when(k == 0)
    def _init():
        o_ref[...] = jnp.zeros_like(o_ref)

    h = jnp.dot(x_ref[...].astype(jnp.bfloat16), we_ref[...],
                preferred_element_type=jnp.float32)
    h = jnp.maximum(h + be_ref[...], 0.0)
    o_ref[...] += jnp.dot(h.astype(wd_ref.dtype), wd_ref[...],
                          preferred_element_type=jnp.float32)

    @pl.when(k == pl.num_programs(1) - 1)
    def _finalize():
        o_ref[...] = o_ref[...] + bd_ref[...]


def _sae_kernel_acc(x_ref, we_ref, be_ref, wd_ref, bd_ref, o_ref, acc_ref):
    """Narrow output dtypes: keep an f32 scratch accumulator across k."""
    k = pl.program_id(1)

    @pl.when(k == 0)
    def _init():
        acc_ref[...] = jnp.zeros_like(acc_ref)

    h = jnp.dot(x_ref[...].astype(jnp.bfloat16), we_ref[...],
                preferred_element_type=jnp.float32)
    h = jnp.maximum(h + be_ref[...], 0.0)
    acc_ref[...] += jnp.dot(h.astype(wd_ref.dtype), wd_ref[...],
                            preferred_element_type=jnp.float32)

    @pl.when(k == pl.num_programs(1) - 1)
    def _finalize():
        o_ref[...] = (acc_ref[...] + bd_ref[...]).astype(o_ref.dtype)


# --------------------------------------------------------------------------
# Parameter preparation (done once) + forward wrapper
# --------------------------------------------------------------------------

def prepare_params(w_enc, b_enc, w_dec, b_dec, *, th=None):
    """Pre-pad / pre-cast / pre-tile PyTorch-layout params for the kernel.

    w_enc: (H, S)  encoder nn.Linear weight
    b_enc: (H,)
    w_dec: (S, H)  decoder nn.Linear weight
    b_dec: (S,)
    """
    H, S = w_enc.shape
    if th is None:
        th, Sp = _select_hidden_tile(S, H)
    else:
        th = max(128, _round_up(th, 128))
        Sp = _round_up(S, 128)
    Hp = _round_up(H, th)
    nk = Hp // th

    # Encoder: (H,S) -> (S,H) -> pad (Sp,Hp) -> contiguous slabs (nk, Sp, th).
    we = jnp.pad(w_enc.astype(jnp.bfloat16).T, ((0, Sp - S), (0, Hp - H)))
    we_tiled = we.reshape(Sp, nk, th).transpose(1, 0, 2)
    # Decoder: (S,H) -> (H,S) -> pad (Hp,Sp); k-slabs are row-contiguous.
    wd = jnp.pad(w_dec.astype(jnp.bfloat16).T, ((0, Hp - H), (0, Sp - S)))
    be = jnp.pad(b_enc.astype(jnp.float32), (0, Hp - H)).reshape(1, Hp)
    bd = jnp.pad(b_dec.astype(jnp.float32), (0, Sp - S)).reshape(1, Sp)

    return dict(we_tiled=we_tiled, b_enc=be, wd=wd, b_dec=bd,
                S=S, H=H, Sp=Sp, Hp=Hp, th=th)


def sparse_autoencoder_forward(x, params, *, tb=None):
    """reconstruction = relu(x @ W_enc.T + b_enc) @ W_dec.T + b_dec."""
    B, S = x.shape
    assert S == params["S"], "stream_width mismatch with prepared params"
    Sp, Hp, th = params["Sp"], params["Hp"], params["th"]
    out_dtype = x.dtype
    x_itemsize = jnp.dtype(x.dtype).itemsize
    out_itemsize = jnp.dtype(out_dtype).itemsize
    needs_acc = out_dtype != jnp.float32

    if tb is None:
        tb, vmem_limit = _select_batch_tile(B, Sp, th, x_itemsize,
                                            out_itemsize, needs_acc)
    else:
        tb = max(8, _round_up(tb, 8))
        _, vmem_limit = _select_batch_tile(B, Sp, th, x_itemsize,
                                           out_itemsize, needs_acc)
    Bp = _round_up(B, tb)

    xp = x
    if (Bp, Sp) != (B, S):
        xp = jnp.pad(x, ((0, Bp - B), (0, Sp - S)))

    n_btiles = Bp // tb
    grid = (n_btiles, Hp // th)

    in_specs = [
        pl.BlockSpec((tb, Sp), lambda i, k: (i, 0)),                    # x tile
        pl.BlockSpec((pl.Squeezed(), Sp, th), lambda i, k: (k, 0, 0)),  # enc slab
        pl.BlockSpec((1, th), lambda i, k: (0, k)),                     # enc bias
        pl.BlockSpec((th, Sp), lambda i, k: (k, 0)),                    # dec slab
        pl.BlockSpec((1, Sp), lambda i, k: (0, 0)),                     # dec bias
    ]
    out_spec = pl.BlockSpec((tb, Sp), lambda i, k: (i, 0))

    # Weights are re-streamed once per batch tile; reflect that in the cost.
    bytes_accessed = (
        Bp * Sp * x_itemsize
        + n_btiles * (params["we_tiled"].size * 2 + params["wd"].size * 2
                      + params["b_enc"].size * 4 + params["b_dec"].size * 4)
        + Bp * Sp * out_itemsize)
    cost = pl.CostEstimate(flops=int(4 * B * S * params["H"]),
                           transcendentals=0,
                           bytes_accessed=int(bytes_accessed))

    kernel = _sae_kernel_acc if needs_acc else _sae_kernel_f32out
    scratch = [pltpu.VMEM((tb, Sp), jnp.float32)] if needs_acc else []

    out = pl.pallas_call(
        kernel,
        out_shape=jax.ShapeDtypeStruct((Bp, Sp), out_dtype),
        grid_spec=pltpu.PrefetchScalarGridSpec(
            num_scalar_prefetch=0,
            grid=grid,
            in_specs=in_specs,
            out_specs=out_spec,
            scratch_shapes=scratch,
        ),
        compiler_params=pltpu.CompilerParams(
            dimension_semantics=("parallel", "arbitrary"),
            vmem_limit_bytes=vmem_limit,
        ),
        cost_estimate=cost,
    )(xp, params["we_tiled"], params["b_enc"], params["wd"], params["b_dec"])

    if (Bp, Sp) != (B, S):
        out = out[:B, :S]
    return out


# --------------------------------------------------------------------------
# Init (mirrors the PyTorch module) + references
# --------------------------------------------------------------------------

def init_params(key, stream_width, hidden_width, dtype=jnp.float32):
    """PyTorch-layout params matching SparseAutoEncoder.__init__.

    encoder weight: kaiming_uniform_(relu)   -> bound = sqrt(2)*sqrt(3/fan_in)
    decoder weight: kaiming_uniform_(linear) -> bound = sqrt(3/fan_in)
    biases: nn.Linear default uniform(-1/sqrt(fan_in), 1/sqrt(fan_in))
    """
    k1, k2, k3, k4 = jax.random.split(key, 4)

    fan_in_enc = stream_width
    bound_we = math.sqrt(2.0) * math.sqrt(3.0 / fan_in_enc)
    w_enc = jax.random.uniform(k1, (hidden_width, stream_width), dtype,
                               minval=-bound_we, maxval=bound_we)
    bound_be = 1.0 / math.sqrt(fan_in_enc)
    b_enc = jax.random.uniform(k2, (hidden_width,), dtype,
                               minval=-bound_be, maxval=bound_be)

    fan_in_dec = hidden_width
    bound_wd = math.sqrt(3.0 / fan_in_dec)
    w_dec = jax.random.uniform(k3, (stream_width, hidden_width), dtype,
                               minval=-bound_wd, maxval=bound_wd)
    bound_bd = 1.0 / math.sqrt(fan_in_dec)
    b_dec = jax.random.uniform(k4, (stream_width,), dtype,
                               minval=-bound_bd, maxval=bound_bd)

    return w_enc, b_enc, w_dec, b_dec


def reference_forward(x, w_enc, b_enc, w_dec, b_dec):
    rep = jnp.maximum(x @ w_enc.T + b_enc, 0.0)
    return rep @ w_dec.T + b_dec


def reference_forward_bf16(x, w_enc, b_enc, w_dec, b_dec):
    """Mimics the kernel's bf16 MXU operands / f32 accumulation."""
    xb = x.astype(jnp.bfloat16)
    we = w_enc.astype(jnp.bfloat16).T
    wd = w_dec.astype(jnp.bfloat16).T
    rep = jnp.maximum(
        jnp.dot(xb, we, preferred_element_type=jnp.float32)
        + b_enc.astype(jnp.float32), 0.0)
    return (jnp.dot(rep.astype(jnp.bfloat16), wd,
                    preferred_element_type=jnp.float32)
            + b_dec.astype(jnp.float32))


if __name__ == "__main__":
    key = jax.random.PRNGKey(0)

    cases = [
        (8, 32, 64),    # (batch, stream_width, hidden_width), aligned-ish
        (5, 40, 96),    # deliberately unaligned -> exercises padding path
    ]
    for idx, (batch, stream_width, hidden_width) in enumerate(cases):
        kx, kp = jax.random.split(jax.random.fold_in(key, idx))
        x = jax.random.normal(kx, (batch, stream_width), jnp.float32)
        w_enc, b_enc, w_dec, b_dec = init_params(kp, stream_width, hidden_width)

        params = prepare_params(w_enc, b_enc, w_dec, b_dec)   # once, off the hot path
        out = sparse_autoencoder_forward(x, params)
        out = jax.block_until_ready(out)
        assert out.shape == (batch, stream_width)

        ref_bf16 = reference_forward_bf16(x, w_enc, b_enc, w_dec, b_dec)
        ref_f32 = reference_forward(x, w_enc, b_enc, w_dec, b_dec)
        assert jnp.allclose(out, ref_bf16, atol=2e-3, rtol=2e-3), \
            f"case {idx}: mismatch vs bf16-matched reference"
        assert jnp.allclose(out, ref_f32, atol=5e-2, rtol=5e-2), \
            f"case {idx}: mismatch vs f32 reference"

    print("KERNEL_OK")
</pallas_src>

<mosaic_0001>
module attributes {stable_mosaic.version = 11 : i64} {
  func.func @_sae_kernel_f32out(%arg0: i32, %arg1: i32, %arg2: memref<8x128xf32, #tpu.memory_space<vmem>>, %arg3: memref<1x128x128xbf16, #tpu.memory_space<vmem>>, %arg4: memref<1x128xf32, #tpu.memory_space<vmem>>, %arg5: memref<128x128xbf16, #tpu.memory_space<vmem>>, %arg6: memref<1x128xf32, #tpu.memory_space<vmem>>, %arg7: memref<8x128xf32, #tpu.memory_space<vmem>>) attributes {dimension_semantics = [#tpu.dimension_semantics<parallel>, #tpu.dimension_semantics<arbitrary>], iteration_bounds = array<i64: 1, 1>, scalar_prefetch = 0 : i64, scratch_operands = 0 : i64, tpu.core_type = #tpu.core_type<tc>, window_params = [{transform_indices = @transform_0, window_bounds = array<i64: 8, 128>}, {transform_indices = @transform_1, window_bounds = array<i64: 1, 128, 128>}, {transform_indices = @transform_2, window_bounds = array<i64: 1, 128>}, {transform_indices = @transform_3, window_bounds = array<i64: 128, 128>}, {pipeline_mode = #tpu.pipeline_mode<synchronous>, transform_indices = @transform_4, window_bounds = array<i64: 1, 128>}, {transform_indices = @transform_5, window_bounds = array<i64: 8, 128>}]} {
    %c0_i32 = arith.constant 0 : i32
    %0 = arith.cmpi eq, %arg1, %c0_i32 : i32
    %1 = arith.extui %0 : i1 to i32
    %c0_i32_0 = arith.constant 0 : i32
    %2 = arith.cmpi ne, %1, %c0_i32_0 : i32
    scf.if %2 {
      %cst_17 = arith.constant 0.000000e+00 : f32
      %22 = vector.broadcast %cst_17 : f32 to vector<8x128xf32>
      %c0_18 = arith.constant 0 : index
      %c0_19 = arith.constant 0 : index
      %23 = vector.load %arg7[%c0_18, %c0_19] : memref<8x128xf32, #tpu.memory_space<vmem>>, vector<8x128xf32>
      tpu.vector_store %arg7[%c0_18, %c0_19], %22 {strides = array<i32>} : memref<8x128xf32, #tpu.memory_space<vmem>>, vector<8x128xf32>,
    } else {
    }
    %c0 = arith.constant 0 : index
    %c0_1 = arith.constant 0 : index
    %3 = vector.load %arg2[%c0, %c0_1] : memref<8x128xf32, #tpu.memory_space<vmem>>, vector<8x128xf32>
    %4 = arith.truncf %3 : vector<8x128xf32> to vector<8x128xbf16>
    %c0_2 = arith.constant 0 : index
    %c0_3 = arith.constant 0 : index
    %c0_4 = arith.constant 0 : index
    %5 = vector.load %arg3[%c0_2, %c0_3, %c0_4] : memref<1x128x128xbf16, #tpu.memory_space<vmem>>, vector<1x128x128xbf16>
    %6 = vector.shape_cast %5 : vector<1x128x128xbf16> to vector<128x128xbf16>
    %cst = arith.constant dense<0.000000e+00> : vector<8x128xf32>
    %7 = tpu.matmul %4, %6, %cst {dimension_numbers = #tpu.dot_dimension_numbers<[1], [0], [0], [1], [0, 0, 1, 1], [], []>} : vector<8x128xbf16>, vector<128x128xbf16>, vector<8x128xf32> -> vector<8x128xf32>
    %c0_5 = arith.constant 0 : index
    %c0_6 = arith.constant 0 : index
    %8 = vector.load %arg4[%c0_5, %c0_6] : memref<1x128xf32, #tpu.memory_space<vmem>>, vector<1x128xf32>
    %9 = vector.broadcast %8 : vector<1x128xf32> to vector<8x128xf32>
    %10 = arith.addf %7, %9 : vector<8x128xf32>
    %cst_7 = arith.constant 0.000000e+00 : f32
    %11 = vector.broadcast %cst_7 : f32 to vector<8x128xf32>
    %12 = arith.maximumf %10, %11 : vector<8x128xf32>
    %c0_8 = arith.constant 0 : index
    %c0_9 = arith.constant 0 : index
    %13 = vector.load %arg7[%c0_8, %c0_9] : memref<8x128xf32, #tpu.memory_space<vmem>>, vector<8x128xf32>
    %14 = arith.truncf %12 : vector<8x128xf32> to vector<8x128xbf16>
    %c0_10 = arith.constant 0 : index
    %c0_11 = arith.constant 0 : index
    %15 = vector.load %arg5[%c0_10, %c0_11] : memref<128x128xbf16, #tpu.memory_space<vmem>>, vector<128x128xbf16>
    %cst_12 = arith.constant dense<0.000000e+00> : vector<8x128xf32>
    %16 = tpu.matmul %14, %15, %cst_12 {dimension_numbers = #tpu.dot_dimension_numbers<[1], [0], [0], [1], [0, 0, 1, 1], [], []>} : vector<8x128xbf16>, vector<128x128xbf16>, vector<8x128xf32> -> vector<8x128xf32>
    %17 = arith.addf %13, %16 : vector<8x128xf32>
    %c0_13 = arith.constant 0 : index
    %c0_14 = arith.constant 0 : index
    %18 = vector.load %arg7[%c0_13, %c0_14] : memref<8x128xf32, #tpu.memory_space<vmem>>, vector<8x128xf32>
    tpu.vector_store %arg7[%c0_13, %c0_14], %17 {strides = array<i32>} : memref<8x128xf32, #tpu.memory_space<vmem>>, vector<8x128xf32>,
    %c0_i32_15 = arith.constant 0 : i32
    %19 = arith.cmpi eq, %arg1, %c0_i32_15 : i32
    %20 = arith.extui %19 : i1 to i32
    %c0_i32_16 = arith.constant 0 : i32
    %21 = arith.cmpi ne, %20, %c0_i32_16 : i32
    scf.if %21 {
      %c0_17 = arith.constant 0 : index
      %c0_18 = arith.constant 0 : index
      %22 = vector.load %arg7[%c0_17, %c0_18] : memref<8x128xf32, #tpu.memory_space<vmem>>, vector<8x128xf32>
      %c0_19 = arith.constant 0 : index
      %c0_20 = arith.constant 0 : index
      %23 = vector.load %arg6[%c0_19, %c0_20] : memref<1x128xf32, #tpu.memory_space<vmem>>, vector<1x128xf32>
      %24 = vector.broadcast %23 : vector<1x128xf32> to vector<8x128xf32>
      %25 = arith.addf %22, %24 : vector<8x128xf32>
      %c0_21 = arith.constant 0 : index
      %c0_22 = arith.constant 0 : index
      %26 = vector.load %arg7[%c0_21, %c0_22] : memref<8x128xf32, #tpu.memory_space<vmem>>, vector<8x128xf32>
      tpu.vector_store %arg7[%c0_21, %c0_22], %25 {strides = array<i32>} : memref<8x128xf32, #tpu.memory_space<vmem>>, vector<8x128xf32>,
    } else {
    }
    return
  }
  func.func @transform_0(%arg0: i32, %arg1: i32) -> (i32, i32) {
    %c0_i32 = arith.constant 0 : i32
    %c0_i32_0 = arith.constant 0 : i32
    return %arg0, %c0_i32 : i32, i32
  }
  func.func @transform_1(%arg0: i32, %arg1: i32) -> (i32, i32, i32) {
    %c0_i32 = arith.constant 0 : i32
    %c0_i32_0 = arith.constant 0 : i32
    %c0_i32_1 = arith.constant 0 : i32
    return %arg1, %c0_i32, %c0_i32_0 : i32, i32, i32
  }
  func.func @transform_2(%arg0: i32, %arg1: i32) -> (i32, i32) {
    %c0_i32 = arith.constant 0 : i32
    %c0_i32_0 = arith.constant 0 : i32
    return %c0_i32, %arg1 : i32, i32
  }
  func.func @transform_3(%arg0: i32, %arg1: i32) -> (i32, i32) {
    %c0_i32 = arith.constant 0 : i32
    %c0_i32_0 = arith.constant 0 : i32
    return %arg1, %c0_i32 : i32, i32
  }
  func.func @transform_4(%arg0: i32, %arg1: i32) -> (i32, i32) {
    %c0_i32 = arith.constant 0 : i32
    %c0_i32_0 = arith.constant 0 : i32
    %c0_i32_1 = arith.constant 0 : i32
    return %c0_i32, %c0_i32_0 : i32, i32
  }
  func.func @transform_5(%arg0: i32, %arg1: i32) -> (i32, i32) {
    %c0_i32 = arith.constant 0 : i32
    %c0_i32_0 = arith.constant 0 : i32
    return %arg0, %c0_i32 : i32, i32
  }
}

</mosaic_0001>

<bundles_post_ra>
// kernel: tpu_custom_call.1
= control target key start
LH: loop header
LB: loop body
LE: loop exit
PB: predicated region body
PF: predicated region fallthrough
CT: control target
= control target key end

     0   :  { %10 = vsyncpa [#allocation3], 0  ;;  %s559_s0 = inlined_call_operand.hbm [shape: f32[8,128], index: 0, kind: input, shape index: {}]   ;;  %s560_s1 = inlined_call_operand.hbm [shape: bf16[1,128,128], index: 1, kind: input, shape index: {}]   ;;  %s561_s2 = inlined_call_operand.vmem [shape: f32[1,128], index: 2, kind: input, shape index: {}]   ;;  %s562_s3 = inlined_call_operand.hbm [shape: bf16[128,128], index: 3, kind: input, shape index: {}]   ;;  %s563_s4 = inlined_call_operand.vmem [shape: f32[1,128], index: 4, kind: input, shape index: {}]   ;;  %s564_s5 = inlined_call_operand.hbm [shape: f32[8,128], index: 5, kind: output, shape index: {}]  }
   0x1   :  { %11 = vsyncpa [#allocation6], 0 }
   0x2   :  { %12 = vsyncpa [#allocation4], 0  ;;  %s503_s18 = smov [#allocation5]  }
   0x3   :  { %s28_s19 = sshll.u32 %s503_s18, 4  ;;  %s29_s19 = int_to_ptr.vmem [resolvable:$true] %s28_s19 }
   0x4   :  { %s425_s20 = scalar_lea.vmem %s29_s19, 1024  ;;  %p430_p1 = scmp.lt.s32.totalorder %s29_s19, %s29_s19 }
   0x5   :  { %p426_p0 = scmp.ne.s32.totalorder %s29_s19, %s425_s20  ;;  %p431_p2 = scmp.lt.s32.totalorder %s425_s20, %s425_s20 }
   0x7   :  { %p432_p3 = por %p431_p2, %p430_p1 }
   0x9   :  { %p433_p4 = pnand %p432_p3, %p426_p0 }
   0xb   :  { %436 = shalt.err (!%p433_p4)
}
   0xc   :  { %s504_s21 = smov 64   ;;  %s505_s22 = smov 4  }
   0xd   :  { %34 = dma.hbm_to_vmem [thread:$0]  %s560_s1, 1024, %s29_s19, [#allocation6], %s504_s21, %s504_s21, %s505_s22  }
   0xe   :  { %s506_s25 = smov [#allocation2]   ;;  %s507_s27 = smov [#allocation7]  }
   0xf   :  { %s19_s26 = sshll.u32 %s506_s25, 4  ;;  %s42_s28 = sshll.u32 %s507_s27, 4  ;;  %s20_s26 = int_to_ptr.vmem [resolvable:$true] %s19_s26  ;;  %s43_s28 = int_to_ptr.vmem [resolvable:$true] %s42_s28 }
  0x10   :  { %s445_s29 = scalar_lea.vmem %s20_s26, 128  ;;  %p450_p6 = scmp.lt.s32.totalorder %s20_s26, %s20_s26 }
  0x11   :  { %p446_p5 = scmp.ne.s32.totalorder %s20_s26, %s445_s29  ;;  %p451_p7 = scmp.lt.s32.totalorder %s445_s29, %s445_s29 }
  0x13   :  { %p452_p8 = por %p451_p7, %p450_p6 }
  0x15   :  { %p453_p9 = pnand %p452_p8, %p446_p5 }
  0x17   :  { %456 = shalt.err (!%p453_p9)
}
  0x18   :  { %22 = dma.hbm_to_vmem [thread:$0]  %s559_s0, 128, %s20_s26, [#allocation3]  }
  0x19   :  { %s465_s7 = scalar_lea.vmem %s43_s28, 1024  ;;  %p470_p11 = scmp.lt.s32.totalorder %s43_s28, %s43_s28 }
  0x1a   :  { %p466_p10 = scmp.ne.s32.totalorder %s43_s28, %s465_s7  ;;  %p471_p12 = scmp.lt.s32.totalorder %s465_s7, %s465_s7 }
  0x1c   :  { %p472_p13 = por %p471_p12, %p470_p11 }
  0x1e   :  { %p473_p0 = pnand %p472_p13, %p466_p10 }
  0x20   :  { %476 = shalt.err (!%p473_p0)
}
  0x21   :  { %48 = dma.hbm_to_vmem [thread:$0]  %s562_s3, 1024, %s43_s28, [#allocation6], %s504_s21, %s504_s21, %s505_s22  }
  0x22   :  { %497 = dma.done.wait [#allocation3], 128  }
  0x23   :  { %498 = vsyncadd [#allocation3], 4294967168 }
  0x24   :  { %499 = dma.done.wait [#allocation6], 2048  }
  0x25   :  { %500 = vsyncadd [#allocation6], 4294965248  ;;  %v508_v0 = vmov 0.0   ;;  %vm509_vm0 = vmmov 0   ;;  %v401_v1 = vld [vmem:[#allocation5 + $0x38] sm:$0xff]   ;;  %v402_v2 = vld [vmem:[#allocation5 + $0x30] sm:$0xff]  }
  0x26   :  { %353 = vmatprep.subr.bf16.mxu0 %v508_v0  ;;  %369 = vmatprep.mubr.msk.bf16.mxu0 %vm509_vm0, %v508_v0  ;;  %v403_v3 = vld [vmem:[#allocation5 + $0x28] sm:$0xff]   ;;  %v409_v4 = vld [vmem:[#allocation7 + $0x38] sm:$0xff]   ;;  %v404_v5 = vld [vmem:[#allocation5 + $0x20] sm:$0xff]   ;;  %s510_s11 = smov [#allocation8]  }
  0x27   :  { %373 = vmatprep.subr.bf16.mxu1 %v508_v0  ;;  %389 = vmatprep.mubr.msk.bf16.mxu1 %vm509_vm0, %v508_v0  ;;  %v410_v6 = vld [vmem:[#allocation7 + $0x30] sm:$0xff]   ;;  %v405_v7 = vld [vmem:[#allocation5 + $0x18] sm:$0xff]   ;;  %v411_v8 = vld [vmem:[#allocation7 + $0x28] sm:$0xff]   ;;  %s307_s12 = sshll.u32 %s510_s11, 4  ;;  %s308_s12 = int_to_ptr.vmem [resolvable:$true] %s307_s12 }
  0x28   :  { %354 = vmatpush3.bf16.msra.mxu0 %v401_v1  ;;  %374 = vmatpush3.bf16.msra.mxu1 %v409_v4  ;;  %v406_v9 = vld [vmem:[#allocation5 + $0x10] sm:$0xff]   ;;  %v412_v10 = vld [vmem:[#allocation7 + $0x20] sm:$0xff]   ;;  %v407_v11 = vld [vmem:[#allocation5 + $0x8] sm:$0xff]   ;;  %p482_p2 = scmp.lt.s32.totalorder %s308_s12, %s308_s12 }
  0x29   :  { %355 = vmatprep.subr.bf16.mxu0 %v508_v0  ;;  %375 = vmatprep.subr.bf16.mxu1 %v508_v0  ;;  %v413_v12 = vld [vmem:[#allocation7 + $0x18] sm:$0xff]   ;;  %v408_v13 = vld [vmem:[#allocation5] sm:$0xff]   ;;  %v414_v15 = vld [vmem:[#allocation7 + $0x10] sm:$0xff]  }
  0x2a   :  { %v66_v14 = vld [vmem:[#allocation2] sm:$0xff]  ;;  %v415_v17 = vld [vmem:[#allocation7 + $0x8] sm:$0xff]   ;;  %v416_v18 = vld [vmem:[#allocation7] sm:$0xff]  }
  0x2b   :  { %v67_v16 = vpack.c.bf16 %v66_v14, %v66_v14  ;;  %v317_v19 = vld [vmem:[%s561_s2] ss:$0 sm:$0xff]  ;;  %s477_s2 = scalar_lea.vmem %s308_s12, 128 }
  0x2c   :  { %356 = vmatpush3.bf16.msra.mxu0 %v402_v2  ;;  %376 = vmatpush3.bf16.msra.mxu1 %v410_v6  ;;  %v334_v28 = vld [vmem:[%s563_s4] ss:$0 sm:$0xff]  ;;  %p478_p1 = scmp.ne.s32.totalorder %s308_s12, %s477_s2  ;;  %p483_p3 = scmp.lt.s32.totalorder %s477_s2, %s477_s2 }
  0x2d   :  { %357 = vmatprep.subr.bf16.mxu0 %v508_v0  ;;  %377 = vmatprep.subr.bf16.mxu1 %v508_v0 }
  0x2e   :  { %p484_p4 = por %p483_p3, %p482_p2 }
  0x30   :  { %358 = vmatpush3.bf16.msra.mxu0 %v403_v3  ;;  %378 = vmatpush3.bf16.msra.mxu1 %v411_v8  ;;  %p485_p5 = pnand %p484_p4, %p478_p1 }
  0x31   :  { %359 = vmatprep.subr.bf16.mxu0 %v508_v0  ;;  %379 = vmatprep.subr.bf16.mxu1 %v508_v0 }
  0x34   :  { %360 = vmatpush3.bf16.msra.mxu0 %v404_v5  ;;  %380 = vmatpush3.bf16.msra.mxu1 %v412_v10 }
  0x35   :  { %361 = vmatprep.subr.bf16.mxu0 %v508_v0  ;;  %381 = vmatprep.subr.bf16.mxu1 %v508_v0 }
  0x38   :  { %362 = vmatpush3.bf16.msra.mxu0 %v405_v7  ;;  %382 = vmatpush3.bf16.msra.mxu1 %v413_v12 }
  0x39   :  { %363 = vmatprep.subr.bf16.mxu0 %v508_v0  ;;  %383 = vmatprep.subr.bf16.mxu1 %v508_v0 }
  0x3c   :  { %364 = vmatpush3.bf16.msra.mxu0 %v406_v9  ;;  %384 = vmatpush3.bf16.msra.mxu1 %v414_v15 }
  0x3d   :  { %365 = vmatprep.subr.bf16.mxu0 %v508_v0  ;;  %385 = vmatprep.subr.bf16.mxu1 %v508_v0 }
  0x40   :  { %366 = vmatpush3.bf16.msra.mxu0 %v407_v11  ;;  %386 = vmatpush3.bf16.msra.mxu1 %v415_v17 }
  0x41   :  { %367 = vmatprep.subr.bf16.mxu0 %v508_v0  ;;  %387 = vmatprep.subr.bf16.mxu1 %v508_v0 }
  0x44   :  { %368 = vmatpush3.bf16.msra.mxu0 %v408_v13  ;;  %388 = vmatpush3.bf16.msra.mxu1 %v416_v18 }
  0x47   :  { %370 = vmatmul.mubr.bf16.vlgmr.msra.gmra.mxu0 %v67_v16 }
 0x107   :  { %v173_v20 = vpop.f32.mrf.mxu0 }
 0x108   :  { %v174_v21 = vadd.f32 %v317_v19, %v173_v20 }
 0x109   :  { %v371_v22 = vpop.f32.mrf.mxu0 }
 0x10a   :  { %v179_v23 = vmax.f32 %v174_v21, 0.0 }
 0x10b   :  { %v176_v24 = vpop.f32.mrf.mxu0 }
 0x10c   :  { %v181_v25 = vpack.c.bf16 %v179_v23, %v179_v23 }
 0x10d   :  { %v372_v26 = vpop.f32.mrf.mxu0 }
 0x10e   :  { %390 = vmatmul.mubr.bf16.vlgmr.msra.gmra.mxu1 %v181_v25 }
 0x1ce   :  { %v280_v27 = vpop.f32.mrf.mxu1 }
 0x1cf   :  { %v299_v30 = vadd.f32 %v334_v28, %v280_v27 }
 0x1d0   :  { %v391_v29 = vpop.f32.mrf.mxu1 }
 0x1d1   :  { %300 = vst [vmem:[#allocation8] sm:$0xff] %v299_v30 }
 0x1d2   :  { %v283_v31 = vpop.f32.mrf.mxu1 }
 0x1d4   :  { %v392_v32 = vpop.f32.mrf.mxu1 }
 0x1d5   :  { %488 = shalt.err (!%p485_p5)
}
 0x1d6   :  { %310 = dma.vmem_to_hbm [thread:$0]  %s308_s12, 128, %s564_s5, [#allocation4]  }
 0x1d7   :  { %501 = dma.done.wait [#allocation4], 128  }
 0x1d8   :  { %502 = vsyncadd [#allocation4], 4294967168 }
 0x1d9   :  { %314 = vsyncpa [#allocation3], 1 }
 0x1da   :  { %315 = vsyncpa [#allocation6], 1 }
 0x1db   :  { %316 = vsyncpa [#allocation4], 1 }

</bundles_post_ra>
